<compile_context>
chip_gen: v5e
topology: v5e:2x2
jax: 0.10.0
libtpu: 0.0.40
codegen_flags: <defaults>
</compile_context>

<pallas_src>
import functools

import jax
import jax.numpy as jnp
from jax import lax
from jax.experimental import pallas as pl
from jax.experimental.pallas import tpu as pltpu


def _image_proj_kernel(x_ref, w_ref, b_ref, gamma_ref, beta_ref, o_ref, *,
                       eps, tokens_per_step, dc):
    # x_ref:     (B_pad, d_in)   resident across all grid steps
    # w_ref:     (k, d_in, Dc)   per-step contiguous weight slab (bf16, double-buffered)
    # b_ref:     (T, Dc)         resident bias (no per-step DMA)
    # gamma_ref: (1, Dc)         resident
    # beta_ref:  (1, Dc)         resident
    # o_ref:     (B_pad, k*Dc)   lane-dense output slab for this step
    x = x_ref[...]
    gamma = gamma_ref[...].astype(jnp.float32)
    beta = beta_ref[...].astype(jnp.float32)
    tok0 = pl.program_id(0) * tokens_per_step

    for i in range(tokens_per_step):
        # (B_pad, d_in) @ (d_in, Dc) on the MXU with f32 accumulation; the bf16
        # weight is upcast in-register (only its HBM bytes are halved).
        y = jnp.dot(x, w_ref[i], preferred_element_type=jnp.float32)
        b_i = b_ref[pl.ds(tok0 + i, 1), :].astype(jnp.float32)       # (1, Dc)
        y = y + b_i

        # LayerNorm over the lane axis (XLU reductions + EUP rsqrt), kept in f32.
        mean = jnp.mean(y, axis=-1, keepdims=True)
        centered = y - mean
        var = jnp.mean(centered * centered, axis=-1, keepdims=True)
        out = centered * lax.rsqrt(var + eps) * gamma + beta
        o_ref[:, i * dc:(i + 1) * dc] = out.astype(o_ref.dtype)


def _tokens_per_step(T, Dc, target_lanes=512):
    """Tokens per grid step: aim for >=512 output lanes per step (amortizes per-step
    overhead / small-DMA inefficiency) while keeping >=2 grid steps so the token
    axis can still shard across TensorCores (v7x megacore)."""
    if Dc % 128 != 0:
        return T          # fall back: every block equals the full array dims
    k = max(1, target_lanes // Dc)
    if T >= 2:
        k = min(k, T // 2)
    k = max(1, min(k, T))
    while T % k != 0:
        k -= 1
    return k


def image_proj_model(image_embeds, proj_w, proj_b, ln_gamma, ln_beta, *,
                     clip_extra_context_tokens, cross_attention_dim,
                     eps=1e-5, weight_dtype=jnp.bfloat16):
    """Forward pass of ImageProjModel.

    image_embeds: (B, clip_embeddings_dim)
    proj_w:       (clip_embeddings_dim, T * cross_attention_dim)   (= torch weight.T)
    proj_b:       (T * cross_attention_dim,)
    ln_gamma:     (cross_attention_dim,)
    ln_beta:      (cross_attention_dim,)
    returns:      (B, T, cross_attention_dim)
    """
    B, d_in = image_embeds.shape
    T = clip_extra_context_tokens
    Dc = cross_attention_dim
    assert proj_w.shape == (d_in, T * Dc)
    assert proj_b.shape == (T * Dc,)

    # Pad batch to the sublane multiple so loads/stores are unmasked
    # (8 rows for 4-byte dtypes, 16 for 2-byte packed dtypes).
    x = image_embeds
    x_itemsize = jnp.dtype(x.dtype).itemsize
    row_mult = 8 if x_itemsize >= 4 else 16
    B_pad = max(row_mult, ((B + row_mult - 1) // row_mult) * row_mult)
    if B_pad != B:
        x = jnp.pad(x, ((0, B_pad - B), (0, 0)))

    # One-time re-layout at trace time: (d_in, T*Dc) -> (T, d_in, Dc) so each grid
    # step's weight slab is one contiguous HBM region; stream it in bf16.
    w3 = proj_w.reshape(d_in, T, Dc).transpose(1, 0, 2).astype(weight_dtype)
    b2d = proj_b.reshape(T, Dc).astype(jnp.float32)
    gamma2d = ln_gamma.reshape(1, Dc).astype(jnp.float32)
    beta2d = ln_beta.reshape(1, Dc).astype(jnp.float32)

    k = _tokens_per_step(T, Dc)
    chunk_w = k * Dc
    n_steps = T // k

    kernel = functools.partial(_image_proj_kernel, eps=eps,
                               tokens_per_step=k, dc=Dc)

    # VMEM budget: residents + double-buffered W & output slabs, capped at 48 MB
    # so it also fits v7x's 64 MiB physical VMEM.
    w_itemsize = jnp.dtype(weight_dtype).itemsize
    out_itemsize = jnp.dtype(image_embeds.dtype).itemsize
    vmem_need = (B_pad * d_in * x_itemsize
                 + 2 * k * d_in * Dc * w_itemsize
                 + 2 * B_pad * chunk_w * out_itemsize
                 + T * Dc * 4 + 2 * Dc * 4)
    vmem_limit = int(min(48 << 20, max(32 << 20, 2 * vmem_need)))

    out2d = pl.pallas_call(
        kernel,
        out_shape=jax.ShapeDtypeStruct((B_pad, T * Dc), image_embeds.dtype),
        grid=(n_steps,),
        in_specs=[
            pl.BlockSpec((B_pad, d_in), lambda t: (0, 0)),     # x: resident
            pl.BlockSpec((k, d_in, Dc), lambda t: (t, 0, 0)),  # W: contiguous per-step slab
            pl.BlockSpec((T, Dc), lambda t: (0, 0)),           # bias: resident
            pl.BlockSpec((1, Dc), lambda t: (0, 0)),           # gamma: resident
            pl.BlockSpec((1, Dc), lambda t: (0, 0)),           # beta:  resident
        ],
        out_specs=pl.BlockSpec((B_pad, chunk_w), lambda t: (0, t)),
        compiler_params=pltpu.CompilerParams(
            dimension_semantics=("parallel",),
            vmem_limit_bytes=vmem_limit),
    )(x, w3, b2d, gamma2d, beta2d)

    # Lane-dense 2-D slab -> (B, T, Dc); reshape/slice are free in the wrapper.
    return out2d.reshape(B_pad, T, Dc)[:B]


def _reference(image_embeds, proj_w, proj_b, ln_gamma, ln_beta, T, Dc, eps=1e-5):
    y = image_embeds.astype(jnp.float32) @ proj_w.astype(jnp.float32) \
        + proj_b.astype(jnp.float32)
    y = y.reshape(-1, T, Dc)
    mean = jnp.mean(y, axis=-1, keepdims=True)
    var = jnp.mean((y - mean) ** 2, axis=-1, keepdims=True)
    return ((y - mean) * lax.rsqrt(var + eps)) * ln_gamma.astype(jnp.float32) \
        + ln_beta.astype(jnp.float32)


if __name__ == "__main__":
    # Small shapes consistent with the module's forward.
    batch = 2                        # exercises the sublane padding path
    clip_embeddings_dim = 128
    cross_attention_dim = 128
    clip_extra_context_tokens = 4

    key = jax.random.PRNGKey(0)
    k_x, k_w, k_b = jax.random.split(key, 3)

    image_embeds = jax.random.normal(
        k_x, (batch, clip_embeddings_dim), dtype=jnp.float32)

    # Deterministic synthetic parameter init (torch.nn.Linear-like scale).
    fan_in = clip_embeddings_dim
    bound = 1.0 / (fan_in ** 0.5)
    proj_w = jax.random.uniform(
        k_w, (clip_embeddings_dim, clip_extra_context_tokens * cross_attention_dim),
        minval=-bound, maxval=bound, dtype=jnp.float32)
    proj_b = jax.random.uniform(
        k_b, (clip_extra_context_tokens * cross_attention_dim,),
        minval=-bound, maxval=bound, dtype=jnp.float32)
    # LayerNorm default init: gamma=1, beta=0.
    ln_gamma = jnp.ones((cross_attention_dim,), dtype=jnp.float32)
    ln_beta = jnp.zeros((cross_attention_dim,), dtype=jnp.float32)

    out = image_proj_model(
        image_embeds, proj_w, proj_b, ln_gamma, ln_beta,
        clip_extra_context_tokens=clip_extra_context_tokens,
        cross_attention_dim=cross_attention_dim)
    out = jax.block_until_ready(out)

    # Reference uses the same bf16-rounded weight the kernel streams, so the only
    # remaining delta is MXU f32-pass rounding -> loose-but-meaningful tolerance.
    w_q = proj_w.astype(jnp.bfloat16).astype(jnp.float32)
    ref = _reference(image_embeds, w_q, proj_b, ln_gamma, ln_beta,
                     clip_extra_context_tokens, cross_attention_dim)
    assert out.shape == (batch, clip_extra_context_tokens, cross_attention_dim)
    assert jnp.allclose(out, ref.astype(out.dtype), atol=2e-2, rtol=2e-2), \
        float(jnp.max(jnp.abs(out - ref)))

    print("KERNEL_OK")
</pallas_src>

<mosaic_0001>
module attributes {stable_mosaic.version = 11 : i64} {
  func.func @_image_proj_kernel(%arg0: i32, %arg1: memref<8x128xf32, #tpu.memory_space<vmem>>, %arg2: memref<2x128x128xbf16, #tpu.memory_space<vmem>>, %arg3: memref<4x128xf32, #tpu.memory_space<vmem>>, %arg4: memref<1x128xf32, #tpu.memory_space<vmem>>, %arg5: memref<1x128xf32, #tpu.memory_space<vmem>>, %arg6: memref<8x256xf32, #tpu.memory_space<vmem>>) attributes {dimension_semantics = [#tpu.dimension_semantics<parallel>], iteration_bounds = array<i64: 2>, scalar_prefetch = 0 : i64, scratch_operands = 0 : i64, tpu.core_type = #tpu.core_type<tc>, window_params = [{pipeline_mode = #tpu.pipeline_mode<synchronous>, transform_indices = @transform_0, window_bounds = array<i64: 8, 128>}, {transform_indices = @transform_1, window_bounds = array<i64: 2, 128, 128>}, {pipeline_mode = #tpu.pipeline_mode<synchronous>, transform_indices = @transform_2, window_bounds = array<i64: 4, 128>}, {pipeline_mode = #tpu.pipeline_mode<synchronous>, transform_indices = @transform_3, window_bounds = array<i64: 1, 128>}, {pipeline_mode = #tpu.pipeline_mode<synchronous>, transform_indices = @transform_4, window_bounds = array<i64: 1, 128>}, {transform_indices = @transform_5, window_bounds = array<i64: 8, 256>}]} {
    %c0 = arith.constant 0 : index
    %c0_0 = arith.constant 0 : index
    %0 = vector.load %arg1[%c0, %c0_0] : memref<8x128xf32, #tpu.memory_space<vmem>>, vector<8x128xf32>
    %c0_1 = arith.constant 0 : index
    %c0_2 = arith.constant 0 : index
    %1 = vector.load %arg4[%c0_1, %c0_2] : memref<1x128xf32, #tpu.memory_space<vmem>>, vector<1x128xf32>
    %c0_3 = arith.constant 0 : index
    %c0_4 = arith.constant 0 : index
    %2 = vector.load %arg5[%c0_3, %c0_4] : memref<1x128xf32, #tpu.memory_space<vmem>>, vector<1x128xf32>
    %c2_i32 = arith.constant 2 : i32
    %3 = arith.muli %arg0, %c2_i32 : i32
    %c0_5 = arith.constant 0 : index
    %c0_6 = arith.constant 0 : index
    %c0_7 = arith.constant 0 : index
    %4 = vector.load %arg2[%c0_5, %c0_6, %c0_7] : memref<2x128x128xbf16, #tpu.memory_space<vmem>>, vector<1x128x128xbf16>
    %5 = vector.shape_cast %4 : vector<1x128x128xbf16> to vector<128x128xbf16>
    %cst = arith.constant dense<0.000000e+00> : vector<8x128xf32>
    %6 = tpu.matmul %0, %5, %cst {dimension_numbers = #tpu.dot_dimension_numbers<[1], [0], [0], [1], [0, 0, 1, 1], [], []>} : vector<8x128xf32>, vector<128x128xbf16>, vector<8x128xf32> -> vector<8x128xf32>
    %c0_i32 = arith.constant 0 : i32
    %7 = arith.addi %3, %c0_i32 : i32
    %8 = arith.index_cast %7 : i32 to index
    %c0_8 = arith.constant 0 : index
    %9 = vector.load %arg3[%8, %c0_8] : memref<4x128xf32, #tpu.memory_space<vmem>>, vector<1x128xf32>
    %10 = vector.broadcast %9 : vector<1x128xf32> to vector<8x128xf32>
    %11 = arith.addf %6, %10 : vector<8x128xf32>
    %cst_9 = arith.constant dense<0.000000e+00> : vector<8xf32>
    %12 = vector.multi_reduction <add>, %11, %cst_9 [1] : vector<8x128xf32> to vector<8xf32>
    %13 = vector.shape_cast %12 : vector<8xf32> to vector<8x1xf32>
    %cst_10 = arith.constant 1.280000e+02 : f32
    %14 = vector.broadcast %cst_10 : f32 to vector<8x1xf32>
    %15 = arith.divf %13, %14 : vector<8x1xf32>
    %16 = vector.broadcast %15 : vector<8x1xf32> to vector<8x128xf32>
    %17 = arith.subf %11, %16 : vector<8x128xf32>
    %18 = arith.mulf %17, %17 : vector<8x128xf32>
    %cst_11 = arith.constant dense<0.000000e+00> : vector<8xf32>
    %19 = vector.multi_reduction <add>, %18, %cst_11 [1] : vector<8x128xf32> to vector<8xf32>
    %20 = vector.shape_cast %19 : vector<8xf32> to vector<8x1xf32>
    %cst_12 = arith.constant 1.280000e+02 : f32
    %21 = vector.broadcast %cst_12 : f32 to vector<8x1xf32>
    %22 = arith.divf %20, %21 : vector<8x1xf32>
    %cst_13 = arith.constant 9.99999974E-6 : f32
    %23 = vector.broadcast %cst_13 : f32 to vector<8x1xf32>
    %24 = arith.addf %22, %23 : vector<8x1xf32>
    %25 = math.rsqrt %24 : vector<8x1xf32>
    %26 = vector.broadcast %25 : vector<8x1xf32> to vector<8x128xf32>
    %27 = arith.mulf %17, %26 : vector<8x128xf32>
    %28 = vector.broadcast %1 : vector<1x128xf32> to vector<8x128xf32>
    %29 = arith.mulf %27, %28 : vector<8x128xf32>
    %30 = vector.broadcast %2 : vector<1x128xf32> to vector<8x128xf32>
    %31 = arith.addf %29, %30 : vector<8x128xf32>
    %c0_14 = arith.constant 0 : index
    %c0_15 = arith.constant 0 : index
    %32 = vector.load %arg6[%c0_14, %c0_15] : memref<8x256xf32, #tpu.memory_space<vmem>>, vector<8x128xf32>
    tpu.vector_store %arg6[%c0_14, %c0_15], %31 {strides = array<i32>} : memref<8x256xf32, #tpu.memory_space<vmem>>, vector<8x128xf32>,
    %c1 = arith.constant 1 : index
    %c0_16 = arith.constant 0 : index
    %c0_17 = arith.constant 0 : index
    %33 = vector.load %arg2[%c1, %c0_16, %c0_17] : memref<2x128x128xbf16, #tpu.memory_space<vmem>>, vector<1x128x128xbf16>
    %34 = vector.shape_cast %33 : vector<1x128x128xbf16> to vector<128x128xbf16>
    %cst_18 = arith.constant dense<0.000000e+00> : vector<8x128xf32>
    %35 = tpu.matmul %0, %34, %cst_18 {dimension_numbers = #tpu.dot_dimension_numbers<[1], [0], [0], [1], [0, 0, 1, 1], [], []>} : vector<8x128xf32>, vector<128x128xbf16>, vector<8x128xf32> -> vector<8x128xf32>
    %c1_i32 = arith.constant 1 : i32
    %36 = arith.addi %3, %c1_i32 : i32
    %37 = arith.index_cast %36 : i32 to index
    %c0_19 = arith.constant 0 : index
    %38 = vector.load %arg3[%37, %c0_19] : memref<4x128xf32, #tpu.memory_space<vmem>>, vector<1x128xf32>
    %39 = vector.broadcast %38 : vector<1x128xf32> to vector<8x128xf32>
    %40 = arith.addf %35, %39 : vector<8x128xf32>
    %cst_20 = arith.constant dense<0.000000e+00> : vector<8xf32>
    %41 = vector.multi_reduction <add>, %40, %cst_20 [1] : vector<8x128xf32> to vector<8xf32>
    %42 = vector.shape_cast %41 : vector<8xf32> to vector<8x1xf32>
    %cst_21 = arith.constant 1.280000e+02 : f32
    %43 = vector.broadcast %cst_21 : f32 to vector<8x1xf32>
    %44 = arith.divf %42, %43 : vector<8x1xf32>
    %45 = vector.broadcast %44 : vector<8x1xf32> to vector<8x128xf32>
    %46 = arith.subf %40, %45 : vector<8x128xf32>
    %47 = arith.mulf %46, %46 : vector<8x128xf32>
    %cst_22 = arith.constant dense<0.000000e+00> : vector<8xf32>
    %48 = vector.multi_reduction <add>, %47, %cst_22 [1] : vector<8x128xf32> to vector<8xf32>
    %49 = vector.shape_cast %48 : vector<8xf32> to vector<8x1xf32>
    %cst_23 = arith.constant 1.280000e+02 : f32
    %50 = vector.broadcast %cst_23 : f32 to vector<8x1xf32>
    %51 = arith.divf %49, %50 : vector<8x1xf32>
    %cst_24 = arith.constant 9.99999974E-6 : f32
    %52 = vector.broadcast %cst_24 : f32 to vector<8x1xf32>
    %53 = arith.addf %51, %52 : vector<8x1xf32>
    %54 = math.rsqrt %53 : vector<8x1xf32>
    %55 = vector.broadcast %54 : vector<8x1xf32> to vector<8x128xf32>
    %56 = arith.mulf %46, %55 : vector<8x128xf32>
    %57 = vector.broadcast %1 : vector<1x128xf32> to vector<8x128xf32>
    %58 = arith.mulf %56, %57 : vector<8x128xf32>
    %59 = vector.broadcast %2 : vector<1x128xf32> to vector<8x128xf32>
    %60 = arith.addf %58, %59 : vector<8x128xf32>
    %c0_25 = arith.constant 0 : index
    %c128 = arith.constant 128 : index
    %61 = vector.load %arg6[%c0_25, %c128] : memref<8x256xf32, #tpu.memory_space<vmem>>, vector<8x128xf32>
    tpu.vector_store %arg6[%c0_25, %c128], %60 {strides = array<i32>} : memref<8x256xf32, #tpu.memory_space<vmem>>, vector<8x128xf32>,
    return
  }
  func.func @transform_0(%arg0: i32) -> (i32, i32) {
    %c0_i32 = arith.constant 0 : i32
    %c0_i32_0 = arith.constant 0 : i32
    %c0_i32_1 = arith.constant 0 : i32
    return %c0_i32, %c0_i32_0 : i32, i32
  }
  func.func @transform_1(%arg0: i32) -> (i32, i32, i32) {
    %c0_i32 = arith.constant 0 : i32
    %c0_i32_0 = arith.constant 0 : i32
    %c0_i32_1 = arith.constant 0 : i32
    return %arg0, %c0_i32, %c0_i32_0 : i32, i32, i32
  }
  func.func @transform_2(%arg0: i32) -> (i32, i32) {
    %c0_i32 = arith.constant 0 : i32
    %c0_i32_0 = arith.constant 0 : i32
    %c0_i32_1 = arith.constant 0 : i32
    return %c0_i32, %c0_i32_0 : i32, i32
  }
  func.func @transform_3(%arg0: i32) -> (i32, i32) {
    %c0_i32 = arith.constant 0 : i32
    %c0_i32_0 = arith.constant 0 : i32
    %c0_i32_1 = arith.constant 0 : i32
    return %c0_i32, %c0_i32_0 : i32, i32
  }
  func.func @transform_4(%arg0: i32) -> (i32, i32) {
    %c0_i32 = arith.constant 0 : i32
    %c0_i32_0 = arith.constant 0 : i32
    %c0_i32_1 = arith.constant 0 : i32
    return %c0_i32, %c0_i32_0 : i32, i32
  }
  func.func @transform_5(%arg0: i32) -> (i32, i32) {
    %c0_i32 = arith.constant 0 : i32
    %c0_i32_0 = arith.constant 0 : i32
    return %c0_i32, %arg0 : i32, i32
  }
}

</mosaic_0001>

<bundles_post_ra>
// kernel: tpu_custom_call.1
= control target key start
LH: loop header
LB: loop body
LE: loop exit
PB: predicated region body
PF: predicated region fallthrough
CT: control target
= control target key end

     0   :  { %s1195_s0 = inlined_call_operand.hbm [shape: f32[8,128], index: 0, kind: input, shape index: {}]   ;;  %s1196_s1 = inlined_call_operand.hbm [shape: bf16[4,128,128], index: 1, kind: input, shape index: {}]   ;;  %s1197_s2 = inlined_call_operand.hbm [shape: f32[4,128], index: 2, kind: input, shape index: {}]   ;;  %s1198_s3 = inlined_call_operand.vmem [shape: f32[1,128], index: 3, kind: input, shape index: {}]   ;;  %s1199_s4 = inlined_call_operand.vmem [shape: f32[1,128], index: 4, kind: input, shape index: {}]   ;;  %s1200_s5 = inlined_call_operand.hbm [shape: f32[8,512], index: 5, kind: output, shape index: {}]  }
   0x1   :  { %1201 = sst [smem:[#allocation13_spill]] %s1195_s0 }
   0x2   :  { %1202 = sst [smem:[#allocation14_spill]] %s1197_s2 }
   0x3   :  { %10 = vsyncpa [#allocation3], 0 }
   0x4   :  { %11 = vsyncpa [#allocation6], 0 }
   0x5   :  { %13 = vsyncpa [#allocation6 + $0x1], 0 }
   0x6   :  { %14 = vsyncpa [#allocation4], 0 }
   0x7   :  { %16 = vsyncpa [#allocation4 + $0x1], 0  ;;  %s1015_s18 = smov 0   ;;  %s1017_s19 = smov 0  }
   0x8   :  { %s1019_s20 = smov 0   ;;  %s1021_s21 = smov 0  }
   0x9 LB: > { %s1036_s22 = sadd.s32 4294967295, %s978_s21   ;;  %s613_s23 = sadd.s32 4294967294, %s978_s21   ;;  %s978_s21 = sphi %s1021_s21, %s1215_s21   ;;  %s974_s20 = sphi %s1019_s20, %s1214_s20   ;;  %s970_s19 = sphi %s1017_s19, %s1213_s19   ;;  %s966_s18 = sphi %s1015_s18, %s1212_s18  }
   0xa   : > { %s1040_s24 = sadd.s32 1, %s978_s21   ;;  %s50_s25 = sadd.s32 1, %s974_s20 }
   0xb   : > { %s47_s26 = ssub.s32 %s978_s21, %s1040_s24  ;;  %p57_p0 = scmp.ne.s32.totalorder %s974_s20, %s970_s19 }
   0xc   : > { %p48_p1 = scmp.eq.s32.totalorder %s47_s26, 0  ;;  %p58_p2 = scmp.eq.s32.totalorder %s978_s21, 0 }
   0xd   : > { %p63_p3 = scmp.ne.s32.totalorder %s970_s19, %s966_s18  ;;  %p64_p4 = scmp.eq.s32.totalorder %s1036_s22, 0 }
   0xe   : > { %s1052_s27 = scalar_select %p48_p1, %s974_s20, %s50_s25  }
   0xf   : > { %p1054_p5 = por %p58_p2, %p57_p0  ;;  %p1060_p6 = por %p64_p4, %p63_p3 }
  0x10   : > { %p150_p7 = scmp.eq.s32.totalorder %s1036_s22, 1  ;;  %p156_p8 = scmp.eq.s32.totalorder %s613_s23, 1 }
  0x11   : > { %p614_p9 = scmp.ge.s32.totalorder %s978_s21, 1  ;;  %p163_p10 = scmp.lt.s32.totalorder %s978_s21, 3 }
  0x12   : > { %p1067_p11 = por %p150_p7, %p57_p0  ;;  %p1071_p12 = por %p156_p8, %p63_p3 }
  0x13   : > { %p1075_p13 = pnand %p614_p9, %p163_p10  ;;  %s1208_s2 = sld [smem:[#allocation14_spill]] }
  0x14   : > { %s980_s11 = smov [#allocation7]   ;;  %p763_p3 = scmp.lt.s32.totalorder %s978_s21, 2 }
  0x15   : > { %p746_p1 = pneg %p1075_p13  ;;  %s189_s12 = sshll.u32 %s980_s11, 4  ;;  %s190_s12 = int_to_ptr.vmem [resolvable:$true] %s189_s12 }
  0x16   : > { %s1209_s0 = sld [smem:[#allocation13_spill]]  ;;  %p1093_p7 = pnand %p763_p3, %p1054_p5 }
  0x17   : > { %p747_p2 = pnand %p746_p1, %p64_p4  ;;  %s981_s17 = smov [#allocation2]  }
  0x18   : > { %s177_s23 = sshll.u32 %s981_s17, 4  ;;  %s206_s25 = sand.u32 1, %s978_s21   ;;  %s178_s23 = int_to_ptr.vmem [resolvable:$true] %s177_s23 }
  0x19   : > { %s187_s10 = sshll.u32 %s1208_s2, 4  ;;  %s208_s26 = sand.u32 1, %s974_s20   ;;  %s188_s10 = int_to_ptr.hbm [resolvable:$true] %s187_s10 }
  0x1a   : > { %752 = dma.hbm_to_vmem [thread:$0]  (!%p747_p2), %s188_s10, 64, %s190_s12, [#allocation6]  }
  0x1b   : > { %s618_s8 = sshll.u32 %s208_s26, 7  ;;  %s716_s9 = sshll.u32 %s978_s21, 7 }
  0x1c   : > { %s175_s15 = sshll.u32 %s1209_s0, 4  ;;  %s216_s13 = scalar_lea.hbm %s1196_s1, %s716_s9  ;;  %s176_s15 = int_to_ptr.hbm [resolvable:$true] %s175_s15 }
  0x1d   : > { %749 = dma.hbm_to_vmem [thread:$0]  (!%p747_p2), %s176_s15, 128, %s178_s23, [#allocation3]  }
  0x1e   : > { %s217_s14 = sshll.u32 %s216_s13, 4  ;;  %s210_s10 = scalar_lea.vmem [#allocation5], %s618_s8  ;;  %s218_s14 = int_to_ptr.hbm [resolvable:$true] %s217_s14 }
  0x1f   : > { %s219_s28 = sshll.u32 %s210_s10, 4  ;;  %s207_s12 = scalar_lea.sflag [#allocation6], %s206_s25  ;;  %s220_s28 = int_to_ptr.vmem [resolvable:$true] %s219_s28 }
  0x20   : > { %s874_s0 = sshra.s32 %s218_s14, 4  ;;  %p878_p8 = pneg %p1093_p7  ;;  %s875_s0 = int_to_ptr.hbm [resolvable:$true] %s874_s0 }
  0x21   : > { %s876_s17 = scalar_lea.hbm %s875_s0, 128  ;;  %s881_s26 = scalar_lea.hbm %s1196_s1, 256 }
  0x22   : > { %p877_p5 = scmp.ne.s32.totalorder %s875_s0, %s876_s17  ;;  %p882_p1 = scmp.lt.s32.totalorder %s875_s0, %s1196_s1 }
  0x23   : > { %p883_p2 = scmp.lt.s32.totalorder %s881_s26, %s876_s17 }
  0x24   : > { %p879_p9 = pnand %p878_p8, %p877_p5 }
  0x25   : > { %p884_p3 = por %p883_p2, %p882_p1 }
  0x26   : > { %p880_p10 = pneg %p879_p9 }
  0x28   : > { %p885_p0 = pnand %p884_p3, %p880_p10 }
  0x2a   : > { %888 = shalt.err (!%p885_p0)
}
  0x2b   : > { %s982_s25 = smov 64   ;;  %s983_s8 = smov 4  }
  0x2c   : > { %756 = dma.hbm_to_vmem [thread:$0]  (!%p1093_p7), %s218_s14, 2048, %s220_s28, %s207_s12, %s982_s25, %s982_s25, %s983_s8  }
  0x2d   : > { %231 = sbr.rel (%p1075_p13) target bundleno = 494 (0x1ee), region = 40 }
  0x32   : > { %949 = dma.done.wait (%p64_p4), [#allocation3], 128  }
  0x33   : > { %951 = vsyncadd (%p64_p4), [#allocation3], 4294967168  ;;  %s238_s0 = sand.u32 1, %s1036_s22   ;;  %s1121_s11 = sand.u32 1, %s970_s19  }
  0x34   : > { %s624_s13 = sshll.u32 %s1121_s11, 7  ;;  %s239_s10 = scalar_lea.sflag [#allocation6], %s238_s0 }
  0x35   : > { %s1124_s16 = scalar_lea.vmem [#allocation5], %s624_s13 }
  0x36   : > { %953 = dma.done.wait (%p1060_p6), %s239_s10, 2048  }
  0x37   : > { %955 = vsyncadd (%p1060_p6), %s239_s10, 4294965248 }
  0x38   : > { %957 = dma.done.wait (%p64_p4), [#allocation6], 64  }
  0x39   : > { %959 = vsyncadd (%p64_p4), [#allocation6], 4294967232  ;;  %v724_v0 = vld [vmem:[%s1124_s16 + $0x38] sm:$0xff]  ;;  %s627_s29 = sshll.u32 %s1036_s22, 1  ;;  %v723_v2 = vld [vmem:[%s1124_s16 + $0x30] sm:$0xff]  ;;  %v984_v23 = vmov 128.0  }
  0x3a   : > { %v732_v1 = vld [vmem:[%s1124_s16 + $0x78] sm:$0xff]  ;;  %348 = vmatpush.bf16.msra.mxu0 %v724_v0  ;;  %v731_v3 = vld [vmem:[%s1124_s16 + $0x70] sm:$0xff]  ;;  %s1139_s7 = scalar_lea.vmem [#allocation7], %s627_s29  ;;  %v722_v4 = vld [vmem:[%s1124_s16 + $0x28] sm:$0xff]  ;;  %808 = vrcp.f32 %v984_v23  ;;  %s626_s12 = sshll.u32 %s1121_s11, 4 }
  0x3b   : > { %465 = vmatpush.bf16.msra.mxu1 %v732_v1  ;;  %v730_v5 = vld [vmem:[%s1124_s16 + $0x68] sm:$0xff]  ;;  %v721_v6 = vld [vmem:[%s1124_s16 + $0x20] sm:$0xff]  ;;  %v720_v8 = vld [vmem:[%s1124_s16 + $0x18] sm:$0xff]  ;;  %s733_s23 = sshll.u32 %s1036_s22, 4  ;;  %s274_s26 = scalar_lea.vmem [#allocation8], %s626_s12 }
  0x3c   : > { %v729_v7 = vld [vmem:[%s1124_s16 + $0x60] sm:$0xff]  ;;  %v728_v9 = vld [vmem:[%s1124_s16 + $0x58] sm:$0xff]  ;;  %v719_v10 = vld [vmem:[%s1124_s16 + $0x10] sm:$0xff]  ;;  %s512_s25 = scalar_lea.hbm %s1200_s5, %s733_s23  ;;  %s514_s8 = sshll.u32 %s274_s26, 4  ;;  %s515_s8 = int_to_ptr.vmem [resolvable:$true] %s514_s8 }
  0x3d   : > { %v727_v11 = vld [vmem:[%s1124_s16 + $0x50] sm:$0xff]  ;;  %v718_v12 = vld [vmem:[%s1124_s16 + $0x8] sm:$0xff]  ;;  %v717_v14 = vld [vmem:[%s1124_s16] sm:$0xff]  ;;  %s516_s0 = sshll.u32 %s512_s25, 4  ;;  %s501_s22 = scalar_lea.sflag [#allocation4], %s1121_s11  ;;  %s517_s0 = int_to_ptr.hbm [resolvable:$true] %s516_s0 }
  0x3e   : > { %349 = vmatpush.bf16.msra.mxu0 %v723_v2  ;;  %v726_v13 = vld [vmem:[%s1124_s16 + $0x48] sm:$0xff]  ;;  %v725_v15 = vld [vmem:[%s1124_s16 + $0x40] sm:$0xff]  ;;  %v277_v16 = vld [vmem:[#allocation2] sm:$0xff]  ;;  %s918_s13 = sshra.s32 %s517_s0, 4  ;;  %s919_s13 = int_to_ptr.hbm [resolvable:$true] %s918_s13 }
  0x3f   : > { %466 = vmatpush.bf16.msra.mxu1 %v731_v3  ;;  %v804_v17 = vld [vmem:[%s1139_s7] ss:$0 sm:$0xff]  ;;  %v805_v20 = vld [vmem:[%s1139_s7 + $0x1] ss:$0 sm:$0xff]  ;;  %s920_s10 = scalar_lea.hbm %s919_s13, 16  ;;  %s924_s7 = scalar_lea.hbm %s1200_s5, 32 }
  0x40   : > { %v809_v24 = vpop.eup %808  ;;  %v806_v52 = vld [vmem:[%s1198_s3] ss:$0 sm:$0xff]  ;;  %p921_p4 = scmp.ne.s32.totalorder %s919_s13, %s920_s10  ;;  %p925_p0 = scmp.lt.s32.totalorder %s919_s13, %s1200_s5 }
  0x41   : > { %v363_v25 = vmul.f32 128.0, %v809_v24  ;;  %vm367_vm0 = vweird.f32 %v809_v24  ;;  %v807_v56 = vld [vmem:[%s1199_s4] ss:$0 sm:$0xff]  ;;  %p926_p7 = scmp.lt.s32.totalorder %s924_s7, %s920_s10 }
  0x42   : > { %350 = vmatpush.bf16.msra.mxu0 %v722_v4  ;;  %p922_p6 = pnand %p921_p4, %p1067_p11 }
  0x43   : > { %467 = vmatpush.bf16.msra.mxu1 %v730_v5  ;;  %v364_v26 = vsub.f32 1.0, %v363_v25  ;;  %p927_p5 = por %p926_p7, %p925_p0 }
  0x44   : > { %p923_p13 = pneg %p922_p6 }
  0x45   : > { %v365_v27 = vmul.f32 %v809_v24, %v364_v26 }
  0x46   : > { %351 = vmatpush.bf16.msra.mxu0 %v721_v6  ;;  %p928_p8 = pnand %p927_p5, %p923_p13 }
  0x47   : > { %468 = vmatpush.bf16.msra.mxu1 %v729_v7  ;;  %v366_v28 = vadd.f32 %v809_v24, %v365_v27 }
  0x49   : > { %v368_v29 = vsel %vm367_vm0, %v809_v24, %v366_v28 }
  0x4a   : > { %352 = vmatpush.bf16.msra.mxu0 %v720_v8 }
  0x4b   : > { %469 = vmatpush.bf16.msra.mxu1 %v728_v9 }
  0x4e   : > { %353 = vmatpush.bf16.msra.mxu0 %v719_v10 }
  0x4f   : > { %470 = vmatpush.bf16.msra.mxu1 %v727_v11 }
  0x52   : > { %354 = vmatpush.bf16.msra.mxu0 %v718_v12 }
  0x53   : > { %471 = vmatpush.bf16.msra.mxu1 %v726_v13 }
  0x56   : > { %355 = vmatpush.bf16.msra.mxu0 %v717_v14 }
  0x57   : > { %472 = vmatpush.bf16.msra.mxu1 %v725_v15 }
  0x59   : > { %356 = vmatmul.f32.vlgmr.msra.gmra.mxu0 %v277_v16 }
  0x5a   : > { %473 = vmatmul.f32.vlgmr.msra.gmra.mxu1 %v277_v16 }
  0xd6   : > { %v357_v18 = vpop.f32.mrf.mxu0 }
  0xd7   : > { %v358_v19 = vadd.f32 %v804_v17, %v357_v18  ;;  %v474_v21 = vpop.f32.mrf.mxu1 }
  0xd8   : > { %v475_v22 = vadd.f32 %v805_v20, %v474_v21 }
  0xd9   : > { %360 = vadd.xlane.f32.xlu0 %v358_v19 }
  0xe1   : > { %477 = vadd.xlane.f32.xlu0 %v475_v22 }
 0x14c   : > { %v361_v30 = vpop.xlane.xlu0 %360 }
 0x14d   : > { %v369_v31 = vmul.f32 %v368_v29, %v361_v30 }
 0x14f   : > { %v370_v32 = vsub.f32 %v358_v19, %v369_v31 }
 0x151   : > { %v371_v33 = vmul.f32 %v370_v32, %v370_v32 }
 0x153   : > { %372 = vadd.xlane.f32.xlu1 %v371_v33 }
 0x154   : > { %v478_v34 = vpop.xlane.xlu0 %477 }
 0x155   : > { %v479_v35 = vmul.f32 %v478_v34, %v368_v29 }
 0x157   : > { %v480_v36 = vsub.f32 %v475_v22, %v479_v35 }
 0x159   : > { %v481_v37 = vmul.f32 %v480_v36, %v480_v36 }
 0x15b   : > { %482 = vadd.xlane.f32.xlu1 %v481_v37 }
 0x1c6   : > { %v373_v38 = vpop.xlane.xlu1 %372 }
 0x1c7   : > { %v374_v39 = vmul.f32 %v373_v38, %v368_v29 }
 0x1c9   : > { %v375_v40 = vadd.f32 1e-05, %v374_v39 }
 0x1cb   : > { %810 = vrsqrt.f32 %v375_v40  ;;  %vm382_vm2 = vweird.f32 %v375_v40 }
 0x1ce   : > { %v483_v41 = vpop.xlane.xlu1 %482 }
 0x1cf   : > { %v484_v42 = vmul.f32 %v483_v41, %v368_v29 }
 0x1d1   : > { %v811_v43 = vpop.eup %810  ;;  %v485_v44 = vadd.f32 1e-05, %v484_v42 }
 0x1d2   : > { %v377_v45 = vmul.f32 %v811_v43, %v375_v40  ;;  %vm383_vm1 = vweird.f32 %v811_v43 }
 0x1d3   : > { %812 = vrsqrt.f32 %v485_v44  ;;  %vm384_vm3 = vmor %vm382_vm2, %vm383_vm1  ;;  %vm492_vm5 = vweird.f32 %v485_v44 }
 0x1d4   : > { %v378_v46 = vmul.f32 %v811_v43, %v377_v45 }
 0x1d6   : > { %v379_v47 = vmul.f32 0.5, %v378_v46 }
 0x1d8   : > { %v380_v48 = vsub.f32 1.5, %v379_v47 }
 0x1d9   : > { %v813_v49 = vpop.eup %812 }
 0x1da   : > { %v381_v50 = vmul.f32 %v811_v43, %v380_v48  ;;  %v487_v51 = vmul.f32 %v813_v49, %v485_v44  ;;  %vm493_vm4 = vweird.f32 %v813_v49 }
 0x1db   : > { %vm494_vm6 = vmor %vm492_vm5, %vm493_vm4 }
 0x1dc   : > { %v385_v53 = vsel %vm384_vm3, %v811_v43, %v381_v50  ;;  %v488_v54 = vmul.f32 %v813_v49, %v487_v51 }
 0x1dd   : > { %v386_v55 = vmul.f32 %v385_v53, %v370_v32 }
 0x1de   : > { %v489_v57 = vmul.f32 0.5, %v488_v54 }
 0x1df   : > { %v390_v58 = vmul.f32 %v806_v52, %v386_v55 }
 0x1e0   : > { %v490_v59 = vsub.f32 1.5, %v489_v57 }
 0x1e1   : > { %v394_v60 = vadd.f32 %v807_v56, %v390_v58 }
 0x1e2   : > { %v491_v61 = vmul.f32 %v813_v49, %v490_v59 }
 0x1e3   : > { %395 = vst [vmem:[%s274_s26] sm:$0xff] %v394_v60 }
 0x1e4   : > { %v495_v62 = vsel %vm494_vm6, %v813_v49, %v491_v61 }
 0x1e5   : > { %v496_v63 = vmul.f32 %v495_v62, %v480_v36 }
 0x1e7   : > { %v497_v0 = vmul.f32 %v806_v52, %v496_v63 }
 0x1e9   : > { %v498_v1 = vadd.f32 %v807_v56, %v497_v0 }
 0x1eb   : > { %499 = vst [vmem:[%s274_s26 + $0x8] sm:$0xff] %v498_v1 }
 0x1ec   : > { %931 = shalt.err (!%p928_p8)
}
 0x1ed   : > { %744 = dma.vmem_to_hbm [thread:$0]  (%p1067_p11), %s515_s8, 256, %s517_s0, %s501_s22  }
 0x1ee PF: > { %s528_s11 = sand.u32 1, %s966_s18   ;;  %p1211_p9 = scmp.ge.s32.totalorder %s978_s21, 2 }
 0x1ef   : > { %s529_s12 = scalar_lea.sflag [#allocation4], %s528_s11 }
 0x1f0   : > { %p758_p10 = pnand %p1211_p9, %p1071_p12 }
 0x1f2   : > { %p759_p1 = pneg %p758_p10 }
 0x1f4   : > { %961 = dma.done.wait (%p759_p1), %s529_s12, 256  }
 0x1f5   : > { %963 = vsyncadd (%p759_p1), %s529_s12, 4294967040  ;;  %p19_p2 = scmp.ge.s32.totalorder %s1040_s24, 4   ;;  %s1212_s18 = smov %s970_s19 }
 0x1f6   : > { %s1213_s19 = smov %s974_s20  ;;  %s1214_s20 = smov %s1052_s27 }
 0x1f7   : > { %s1215_s21 = smov %s1040_s24  ;;  %21 = sbr.rel (!%p19_p2) target bundleno = 9 (0x9), region = 97 }
 0x1fc   :  { %535 = vsyncpa [#allocation3], 1 }
 0x1fd   :  { %537 = vsyncpa [#allocation3 + $0x1], 1 }
 0x1fe   :  { %538 = vsyncpa [#allocation6], 1 }
 0x1ff   :  { %540 = vsyncpa [#allocation6 + $0x1], 1 }
 0x200   :  { %541 = vsyncpa [#allocation4], 1 }
 0x201   :  { %543 = vsyncpa [#allocation4 + $0x1], 1 }

</bundles_post_ra>
